<compile_context>
chip_gen: v6e
topology: v6e:2x2x1
jax: 0.10.0
libtpu: 0.0.40
codegen_flags: <defaults>
</compile_context>

<pallas_src>
import jax
import jax.numpy as jnp
from jax.experimental import pallas as pl
from jax.experimental.pallas import tpu as pltpu

# Module defaults (constructor args of UnitT).
POS_MULT = 2.0
NEG_MULT = -2.0
CLIP_MIN = -8.0
CLIP_MAX = 8.0

LANES = 128

# Truthiness check mirrors `if self.clip_min and self.clip_max:` in PyTorch.
_CLIPPING = bool(CLIP_MIN) and bool(CLIP_MAX)
# where(x>0, p*x, n*x) == p*|x| when n == -p and p >= 0; clip_min is then a no-op.
_SPECIALIZED = (NEG_MULT == -POS_MULT) and (POS_MULT >= 0.0) and (CLIP_MIN <= 0.0)


def unit_t_kernel(x_ref, o_ref):
    x = x_ref[...]
    if _SPECIALIZED and _CLIPPING:
        # 3 VPU ops: abs, mul, min.
        y = jnp.minimum(jnp.abs(x) * jnp.asarray(POS_MULT, x.dtype),
                        jnp.asarray(CLIP_MAX, x.dtype))
    else:
        # General form: fold the multipliers -> one select + one mul (+ clip).
        mult = jnp.where(x > 0,
                         jnp.asarray(POS_MULT, x.dtype),
                         jnp.asarray(NEG_MULT, x.dtype))
        y = x * mult
        if _CLIPPING:
            y = jnp.clip(y,
                         jnp.asarray(CLIP_MIN, x.dtype),
                         jnp.asarray(CLIP_MAX, x.dtype))
    o_ref[...] = y


def _native_sublanes(dtype):
    """8 for 4-byte, 16 for 2-byte, 32 for 1-byte dtypes."""
    itemsize = jnp.dtype(dtype).itemsize
    return 8 * max(1, 4 // max(itemsize, 1))


def _tuning():
    """(block_bytes, vmem_limit_bytes or None) per TPU generation."""
    try:
        kind = jax.devices()[0].device_kind.lower()
    except Exception:  # pragma: no cover - defensive
        kind = ""
    if "7" in kind:                       # v7x: 64 MiB physical / 32 MiB default scoped
        return 6 << 20, 48 << 20          # 4 live buffers * 6 MiB = 24 MiB
    if "v6" in kind:                      # v6e: 128 MiB physical / 32 MiB default scoped
        return 4 << 20, 28 << 20          # 4 * 4 MiB = 16 MiB
    if "v5 lite" in kind or "v5e" in kind or "v5lite" in kind:
        return 2 << 20, None              # 4 * 2 MiB = 8 MiB < 16 MiB default scoped
    return 2 << 20, None                  # conservative default for unknown chips


def _unit_t_2d(x2d, donate):
    """Run the kernel on a lane-dense (rows, 128) slab."""
    rows, lanes = x2d.shape
    assert lanes == LANES
    dtype = x2d.dtype
    itemsize = jnp.dtype(dtype).itemsize
    sublanes = _native_sublanes(dtype)
    block_bytes, vmem_limit = _tuning()

    if rows <= sublanes:
        # Block == full array (allowed even when rows isn't a sublane multiple).
        tile_rows = rows
    else:
        target_rows = max(sublanes, block_bytes // (LANES * itemsize))
        tile_rows = min(rows, target_rows)
        # Keep >= ~4 grid steps so megacore sharding can use both v7x TCs.
        cap = max(sublanes, pl.cdiv(rows, 4))
        tile_rows = min(tile_rows, cap)
        # Sublane-aligned block (last partial block is masked by Pallas).
        tile_rows = max(sublanes, (tile_rows // sublanes) * sublanes)
    grid = (pl.cdiv(rows, tile_rows),)

    work = rows * LANES
    cost = pl.CostEstimate(
        flops=(3 if (_SPECIALIZED and _CLIPPING) else 4) * work,
        transcendentals=0,
        bytes_accessed=2 * work * itemsize,
    )

    cp_kwargs = dict(dimension_semantics=("parallel",))
    if vmem_limit is not None:
        cp_kwargs["vmem_limit_bytes"] = vmem_limit

    call_kwargs = {}
    if donate:
        # Only alias when the caller explicitly donates; otherwise XLA would
        # insert a defensive copy of a still-live input buffer.
        call_kwargs["input_output_aliases"] = {0: 0}

    return pl.pallas_call(
        unit_t_kernel,
        out_shape=jax.ShapeDtypeStruct((rows, LANES), dtype),
        grid_spec=pltpu.PrefetchScalarGridSpec(
            num_scalar_prefetch=0,
            grid=grid,
            in_specs=[pl.BlockSpec((tile_rows, LANES), lambda i: (i, 0))],
            out_specs=pl.BlockSpec((tile_rows, LANES), lambda i: (i, 0)),
        ),
        compiler_params=pltpu.CompilerParams(**cp_kwargs),
        cost_estimate=cost,
        **call_kwargs,
    )(x2d)


def _reference(x):
    """Pure-jnp reference (also used for the tiny ragged tail)."""
    y = jnp.where(x > 0,
                  jnp.asarray(POS_MULT, x.dtype) * x,
                  jnp.asarray(NEG_MULT, x.dtype) * x)
    if _CLIPPING:
        y = jnp.clip(y, jnp.asarray(CLIP_MIN, x.dtype), jnp.asarray(CLIP_MAX, x.dtype))
    return y


def unit_t(x, donate=False):
    """Apply UnitT activation. x: any shape (e.g. NCHW), float dtype.

    Set donate=True only when the caller does not need `x` afterwards (lets
    the kernel write its output in place over the input buffer).
    """
    orig_shape = x.shape
    total = x.size
    if total == 0:
        return x

    x_flat = x.reshape(-1)
    main = (total // LANES) * LANES

    if main == total:
        # Fast path: lane-aligned, no padding, no extra HBM passes.
        out2d = _unit_t_2d(x_flat.reshape(-1, LANES), donate)
        return out2d.reshape(orig_shape)

    # Ragged path: kernel on the 128-aligned prefix, plain jnp on the tail.
    tail_out = _reference(x_flat[main:])
    if main == 0:
        return tail_out.reshape(orig_shape)
    # Prefix slice is a temporary buffer -> safe/free to alias in-place.
    main_out = _unit_t_2d(x_flat[:main].reshape(-1, LANES), donate=True).reshape(-1)
    return jnp.concatenate([main_out, tail_out]).reshape(orig_shape)


if __name__ == "__main__":
    key = jax.random.PRNGKey(0)

    # NCHW input (PyTorch convention); total is a multiple of 128 -> aligned fast path.
    x = jax.random.normal(key, (2, 4, 16, 16), dtype=jnp.float32) * 6.0
    y = unit_t(x)
    jax.block_until_ready(y)
    assert jnp.allclose(y, _reference(x), atol=1e-6), "mismatch vs reference (aligned path)"
    assert y.shape == x.shape and y.dtype == x.dtype

    # Ragged input exercises the prefix-kernel + jnp-tail path (no pad/slice passes).
    x2 = jax.random.normal(jax.random.PRNGKey(1), (3, 5, 7, 11), dtype=jnp.float32) * 6.0
    y2 = unit_t(x2)
    jax.block_until_ready(y2)
    assert jnp.allclose(y2, _reference(x2), atol=1e-6), "mismatch vs reference (ragged path)"
    assert y2.shape == x2.shape and y2.dtype == x2.dtype

    print("KERNEL_OK")
</pallas_src>

<mosaic_0001>
module attributes {stable_mosaic.version = 11 : i64} {
  func.func @unit_t_kernel(%arg0: i32, %arg1: memref<8x128xf32, #tpu.memory_space<vmem>>, %arg2: memref<8x128xf32, #tpu.memory_space<vmem>>) attributes {dimension_semantics = [#tpu.dimension_semantics<parallel>], iteration_bounds = array<i64: 2>, scalar_prefetch = 0 : i64, scratch_operands = 0 : i64, tpu.core_type = #tpu.core_type<tc>, window_params = [{transform_indices = @transform_0, window_bounds = array<i64: 8, 128>}, {transform_indices = @transform_1, window_bounds = array<i64: 8, 128>}]} {
    %c0 = arith.constant 0 : index
    %c0_0 = arith.constant 0 : index
    %0 = vector.load %arg1[%c0, %c0_0] : memref<8x128xf32, #tpu.memory_space<vmem>>, vector<8x128xf32>
    %1 = math.absf %0 : vector<8x128xf32>
    %cst = arith.constant 2.000000e+00 : f32
    %2 = vector.broadcast %cst : f32 to vector<8x128xf32>
    %3 = arith.mulf %1, %2 : vector<8x128xf32>
    %cst_1 = arith.constant 8.000000e+00 : f32
    %4 = vector.broadcast %cst_1 : f32 to vector<8x128xf32>
    %5 = arith.minimumf %3, %4 : vector<8x128xf32>
    %c0_2 = arith.constant 0 : index
    %c0_3 = arith.constant 0 : index
    %6 = vector.load %arg2[%c0_2, %c0_3] : memref<8x128xf32, #tpu.memory_space<vmem>>, vector<8x128xf32>
    tpu.vector_store %arg2[%c0_2, %c0_3], %5 {strides = array<i32>} : memref<8x128xf32, #tpu.memory_space<vmem>>, vector<8x128xf32>,
    return
  }
  func.func @transform_0(%arg0: i32) -> (i32, i32) {
    %c0_i32 = arith.constant 0 : i32
    %c0_i32_0 = arith.constant 0 : i32
    return %arg0, %c0_i32 : i32, i32
  }
  func.func @transform_1(%arg0: i32) -> (i32, i32) {
    %c0_i32 = arith.constant 0 : i32
    %c0_i32_0 = arith.constant 0 : i32
    return %arg0, %c0_i32 : i32, i32
  }
}

</mosaic_0001>

<bundles_post_ra>
// kernel: tpu_custom_call.1
= control target key start
LH: loop header
LB: loop body
LE: loop exit
PB: predicated region body
PF: predicated region fallthrough
CT: control target
= control target key end

     0   :  { %6 = vsyncpa [#allocation3], 0  ;;  %s526_s0 = inlined_call_operand.hbm [shape: f32[16,128], index: 0, kind: input, shape index: {}]   ;;  %s527_s1 = inlined_call_operand.hbm [shape: f32[16,128], index: 1, kind: output, shape index: {}]  }
   0x1   :  { %8 = vsyncpa [#allocation3 + $0x1], 0 }
   0x2   :  { %9 = vsyncpa [#allocation4], 0 }
   0x3   :  { %11 = vsyncpa [#allocation4 + $0x1], 0  ;;  %s385_s6 = smov 0   ;;  %s387_s7 = smov 0  }
   0x4   :  { %s389_s8 = smov 0   ;;  %s391_s9 = smov 0  }
   0x5 LB: > { %s406_s10 = sadd.s32 4294967295, %s371_s9   ;;  %s221_s11 = sadd.s32 4294967294, %s371_s9   ;;  %s371_s9 = sphi %s391_s9, %s544_s9   ;;  %s367_s8 = sphi %s389_s8, %s543_s8   ;;  %s363_s7 = sphi %s387_s7, %s542_s7   ;;  %s359_s6 = sphi %s385_s6, %s541_s6  }
   0x6   : > { %s410_s12 = sadd.s32 1, %s371_s9   ;;  %s24_s13 = sadd.s32 1, %s367_s8 }
   0x7   : > { %s21_s14 = ssub.s32 %s371_s9, %s410_s12  ;;  %p31_p0 = scmp.ne.s32.totalorder %s367_s8, %s363_s7 }
   0x8   : > { %p22_p1 = scmp.eq.s32.totalorder %s21_s14, 0  ;;  %p32_p2 = scmp.eq.s32.totalorder %s371_s9, 0 }
   0x9   : > { %p37_p3 = scmp.ne.s32.totalorder %s363_s7, %s359_s6  ;;  %p38_p4 = scmp.eq.s32.totalorder %s406_s10, 0 }
   0xa   : > { %s422_s15 = scalar_select %p22_p1, %s367_s8, %s24_s13  }
   0xb   : > { %p424_p5 = por %p32_p2, %p31_p0  ;;  %p428_p6 = por %p38_p4, %p37_p3 }
   0xc   : > { %p61_p7 = scmp.eq.s32.totalorder %s406_s10, 1  ;;  %p67_p8 = scmp.eq.s32.totalorder %s221_s11, 1 }
   0xd   : > { %s531_s17 = scalar_select %p428_p6, 1, 0 }
   0xe   : > { %p245_p10 = scmp.lt.s32.totalorder %s371_s9, 2  ;;  %p435_p11 = por %p61_p7, %p31_p0 }
   0xf   : > { %p439_p12 = por %p67_p8, %p37_p3  ;;  %s87_s20 = sand.u32 1, %s367_s8  }
  0x10   : > { %s532_s18 = scalar_select %p435_p11, 1, 0 }
  0x11   : > { %s533_s19 = scalar_select %p439_p12, 1, 0 }
  0x12   : > { %s225_s21 = sshll.u32 %s371_s9, 7  ;;  %s224_s22 = sshll.u32 %s87_s20, 3 }
  0x13   : > { %s448_s25 = scalar_lea.hbm %s526_s0, %s225_s21  ;;  %s91_s26 = scalar_lea.vmem [#allocation2], %s224_s22 }
  0x14   : > { %s98_s27 = sshll.u32 %s91_s26, 4  ;;  %p452_p13 = pnand %p245_p10, %p424_p5  ;;  %s456_s27 = int_to_ptr.vmem [resolvable:$true] %s98_s27 }
  0x15   : > { %s88_s29 = scalar_lea.sflag [#allocation3], %s87_s20  ;;  %s279_s30 = scalar_lea.hbm %s448_s25, 128 }
  0x16   : > { %p280_p2 = scmp.ne.s32.totalorder %s448_s25, %s279_s30  ;;  %p281_p3 = pneg %p452_p13 }
  0x17   : > { %s284_s4 = scalar_lea.hbm %s526_s0, 256  ;;  %p285_p5 = scmp.lt.s32.totalorder %s448_s25, %s526_s0 }
  0x18   : > { %p282_p4 = pnand %p281_p3, %p280_p2  ;;  %p286_p8 = scmp.lt.s32.totalorder %s284_s4, %s279_s30 }
  0x1a   : > { %p283_p7 = pneg %p282_p4  ;;  %p287_p10 = por %p286_p8, %p285_p5 }
  0x1c   : > { %p288_p9 = pnand %p287_p10, %p283_p7 }
  0x1e   : > { %291 = shalt.err (!%p288_p9)
}
  0x1f   : > { %s292_s13 = scalar_lea.vmem %s456_s27, 128  ;;  %s373_s14 = smov [#allocation2]  }
  0x20   : > { %p293_p0 = scmp.ne.s32.totalorder %s456_s27, %s292_s13  ;;  %s297_s16 = sshll.u32 %s373_s14, 4  ;;  %s298_s16 = int_to_ptr.vmem [resolvable:$false] %s297_s16 }
  0x21   : > { %s299_s20 = scalar_lea.vmem %s298_s16, 256  ;;  %p300_p4 = scmp.lt.s32.totalorder %s456_s27, %s298_s16 }
  0x22   : > { %p295_p1 = pnand %p293_p0, %p281_p3  ;;  %p301_p12 = scmp.lt.s32.totalorder %s299_s20, %s292_s13 }
  0x24   : > { %p296_p2 = pneg %p295_p1  ;;  %p302_p11 = por %p301_p12, %p300_p4 }
  0x26   : > { %p303_p6 = pnand %p302_p11, %p296_p2 }
  0x28   : > { %306 = shalt.err (!%p303_p6)
}
  0x29   : > { %240 = dma.hbm_to_vmem [thread:$0]  (!%p452_p13), %s448_s25, 128, %s456_s27, %s88_s29  }
  0x2a   : > { %p535_p9 = scmp.lt.s32.totalorder %s371_s9, 3  ;;  %p536_p7 = scmp.ge.s32.totalorder %s371_s9, 1 }
  0x2c   : > { %p104_p0 = pnand %p536_p7, %p535_p9 }
  0x2d   : > { %s483_s21 = sand.u32 (!%p104_p0), 1, %s363_s7   ;;  %p537_p6 = scmp.ne.s32.totalorder (!%p104_p0), %s531_s17, 0 }
  0x2e   : > { %107 = sbr.rel (%p104_p0) target bundleno = 77 (0x4d), region = 24  ;;  %s227_s22 = sshll.u32 (!%p104_p0), %s483_s21, 3 }
  0x2f   : > { %s110_s23 = scalar_lea.sflag (!%p104_p0), [#allocation3], %s483_s21  ;;  %s113_s24 = scalar_lea.vmem (!%p104_p0), [#allocation2], %s227_s22 }
  0x33   : > { %350 = dma.done.wait (%p537_p6), %s110_s23, 128  }
  0x34   : > { %352 = vsyncadd (%p537_p6), %s110_s23, 4294967168  ;;  %v132_v0 = vld [vmem:[%s113_s24] sm:$0xff]  ;;  %s131_s25 = scalar_lea.vmem [#allocation5], %s227_s22  ;;  %s230_s27 = sshll.u32 %s406_s10, 7 }
  0x35   : > { %v133_v1 = vand.u32 2147483647, %v132_v0  ;;  %s151_s26 = sshll.u32 %s131_s25, 4  ;;  %s149_s30 = scalar_lea.hbm %s527_s1, %s230_s27  ;;  %s152_s26 = int_to_ptr.vmem [resolvable:$true] %s151_s26 }
  0x36   : > { %s138_s2 = scalar_lea.sflag [#allocation4], %s483_s21  ;;  %s307_s3 = scalar_lea.vmem %s152_s26, 128 }
  0x37   : > { %v134_v2 = vmul.f32 2.0, %v133_v1  ;;  %p308_p11 = scmp.ne.s32.totalorder %s152_s26, %s307_s3  ;;  %p538_p12 = scmp.ne.s32.totalorder %s532_s18, 0 }
  0x38   : > { %s374_s17 = smov [#allocation5]  }
  0x39   : > { %v135_v3 = vmin.f32 %v134_v2, 8.0  ;;  %p309_p13 = pnand %p308_p11, %p538_p12  ;;  %s311_s4 = sshll.u32 %s374_s17, 4  ;;  %s312_s4 = int_to_ptr.vmem [resolvable:$false] %s311_s4 }
  0x3a   : > { %s313_s5 = scalar_lea.vmem %s312_s4, 256  ;;  %p314_p3 = scmp.lt.s32.totalorder %s152_s26, %s312_s4 }
  0x3b   : > { %136 = vst [vmem:[%s131_s25] sm:$0xff] %v135_v3  ;;  %p310_p1 = pneg %p309_p13  ;;  %p315_p5 = scmp.lt.s32.totalorder %s313_s5, %s307_s3 }
  0x3d   : > { %p316_p8 = por %p315_p5, %p314_p3 }
  0x3f   : > { %p317_p10 = pnand %p316_p8, %p310_p1 }
  0x41   : > { %320 = shalt.err (!%p317_p10)
}
  0x42   : > { %s321_s10 = scalar_lea.hbm %s149_s30, 128  ;;  %s325_s14 = scalar_lea.hbm %s527_s1, 256 }
  0x43   : > { %p322_p2 = scmp.ne.s32.totalorder %s149_s30, %s321_s10  ;;  %p326_p7 = scmp.lt.s32.totalorder %s149_s30, %s527_s1 }
  0x44   : > { %p327_p0 = scmp.lt.s32.totalorder %s325_s14, %s321_s10 }
  0x45   : > { %p323_p4 = pnand %p322_p2, %p538_p12 }
  0x46   : > { %p328_p6 = por %p327_p0, %p326_p7 }
  0x47   : > { %p324_p9 = pneg %p323_p4 }
  0x49   : > { %p329_p11 = pnand %p328_p6, %p324_p9 }
  0x4b   : > { %332 = shalt.err (!%p329_p11)
}
  0x4c   : > { %235 = dma.vmem_to_hbm [thread:$0]  (%p538_p12), %s152_s26, 128, %s149_s30, %s138_s2  }
  0x4d PF: > { %s163_s21 = sand.u32 1, %s359_s6   ;;  %p539_p13 = scmp.ne.s32.totalorder %s533_s19, 0 }
  0x4e   : > { %p540_p1 = scmp.ge.s32.totalorder %s371_s9, 2  ;;  %s164_s22 = scalar_lea.sflag [#allocation4], %s163_s21 }
  0x50   : > { %p242_p3 = pnand %p540_p1, %p539_p13 }
  0x52   : > { %p243_p5 = pneg %p242_p3 }
  0x54   : > { %354 = dma.done.wait (%p243_p5), %s164_s22, 128  }
  0x55   : > { %356 = vsyncadd (%p243_p5), %s164_s22, 4294967168  ;;  %p14_p8 = scmp.ge.s32.totalorder %s410_s12, 4   ;;  %s541_s6 = smov %s363_s7 }
  0x56   : > { %s542_s7 = smov %s367_s8  ;;  %s543_s8 = smov %s422_s15 }
  0x57   : > { %s544_s9 = smov %s410_s12  ;;  %16 = sbr.rel (!%p14_p8) target bundleno = 5 (0x5), region = 69 }
  0x5c   :  { %169 = vsyncpa [#allocation3], 1 }
  0x5d   :  { %171 = vsyncpa [#allocation3 + $0x1], 1 }
  0x5e   :  { %172 = vsyncpa [#allocation4], 1 }
  0x5f   :  { %174 = vsyncpa [#allocation4 + $0x1], 1 }

</bundles_post_ra>
